<compile_context>
chip_gen: v7x
topology: tpu7x:2x2x1
jax: 0.10.0
libtpu: 0.0.40
codegen_flags: <defaults>
</compile_context>

<pallas_src>
import jax
import jax.numpy as jnp
from jax.experimental import pallas as pl
from jax.experimental.pallas import tpu as pltpu


def _round_up(x, m):
    return -(-x // m) * m


def _dense_fusion_kernel(g_ref, b_ref, wg_ref, wb_ref, bias_ref,
                         gamma_ref, beta_ref, out_ref):
    cdt = wg_ref.dtype
    # Folded projections (MXU, f32 accumulation).  LHS is cast to the weight
    # dtype in-kernel so the bf16 path runs as native single-pass matmuls.
    acc = jnp.dot(g_ref[...].astype(cdt), wg_ref[...],
                  preferred_element_type=jnp.float32)            # (TM, D)
    acc = acc + jnp.dot(b_ref[...].astype(cdt), wb_ref[...],
                        preferred_element_type=jnp.float32)      # (TM, D)
    fused = jnp.tanh(acc + bias_ref[...])                        # (TM, D), f32

    # Dropout: eval-mode identity.
    # TODO(synk): training-mode dropout (pltpu.prng_*) not implemented.

    # LayerNorm over features (eps = 1e-5, nn.LayerNorm default), f32 math.
    # Single-pass stats: var = E[x^2] - mu^2 (safe: tanh bounds x to [-1, 1]).
    mu = jnp.mean(fused, axis=-1, keepdims=True)
    ex2 = jnp.mean(fused * fused, axis=-1, keepdims=True)
    var = ex2 - mu * mu
    y = (fused - mu) * jax.lax.rsqrt(var + 1e-5)
    out_ref[...] = (y * gamma_ref[...] + beta_ref[...]).astype(out_ref.dtype)


def dense_fusion(gpt2_features, bert_features, attention_mask, params, *,
                 block_rows=512, compute_dtype=jnp.bfloat16):
    """Pallas implementation of DenseFusionLayer.forward (eval mode).

    gpt2_features: (B, S, Dg) f32
    bert_features: (B, S, Db) f32
    attention_mask: (B, S) — unused by the module's forward (API parity only).
    compute_dtype: dtype of the MXU operands (weights + in-kernel LHS cast).
    """
    del attention_mask  # not used by DenseFusionLayer.forward
    B, S, Dg = gpt2_features.shape
    _, _, Db = bert_features.shape
    D = params["wd"].shape[1]

    # Row-flatten (free reshape).  Activations stay f32 in HBM; the cast to
    # compute_dtype happens in-kernel under the MXU shadow.
    M = B * S
    g2 = gpt2_features.reshape(M, Dg)
    bf = bert_features.reshape(M, Db)

    # --- Fold the three matmuls into one set of weights (once, in f32). ---
    wd = params["wd"].astype(jnp.float32)
    wg_f = (params["wg"].astype(jnp.float32) @ wd).astype(compute_dtype)   # (Dg, D)
    wb_f = (params["wb"].astype(jnp.float32) @ wd).astype(compute_dtype)   # (Db, D)
    bias_f = ((params["bg"].astype(jnp.float32)
               + params["bb"].astype(jnp.float32)) @ wd
              + params["bd"].astype(jnp.float32)).reshape(1, D)            # f32
    gamma = params["gamma"].astype(jnp.float32).reshape(1, D)
    beta = params["beta"].astype(jnp.float32).reshape(1, D)

    # --- Row-tile size: dtype-aware sublane rounding; keep >=2 grid steps for
    #     megacore sharding when M allows. ---
    itemsize_c = jnp.dtype(compute_dtype).itemsize
    sublane = {4: 8, 2: 16, 1: 32}.get(itemsize_c, 8)
    tm = min(block_rows, max(sublane, _round_up(pl.cdiv(M, 2), sublane)))
    grid = pl.cdiv(M, tm)

    # --- Explicit VMEM budget sized from residency (weights + double-buffered
    #     row tiles + f32 intermediates), clamped to be safe on v5e/v6e/v7x. ---
    weight_bytes = (Dg + Db) * D * itemsize_c + 3 * D * 4
    tile_bytes = tm * (Dg + Db) * 4 + tm * D * 4
    est = 2 * weight_bytes + 2 * tile_bytes + 6 * tm * D * 4
    vmem_limit = int(min(64 * 2**20, max(32 * 2**20, 2 * est)))

    in_specs = [
        pl.BlockSpec((tm, Dg), lambda i: (i, 0)),
        pl.BlockSpec((tm, Db), lambda i: (i, 0)),
        # Grid-invariant operands: constant index maps keep them VMEM-resident
        # across the whole grid.
        # TODO(synk): pipeline_mode=pl.Buffered(1) on these would halve their
        # VMEM footprint for large D on v7x (64 MiB physical VMEM).
        pl.BlockSpec((Dg, D), lambda i: (0, 0)),
        pl.BlockSpec((Db, D), lambda i: (0, 0)),
        pl.BlockSpec((1, D), lambda i: (0, 0)),
        pl.BlockSpec((1, D), lambda i: (0, 0)),
        pl.BlockSpec((1, D), lambda i: (0, 0)),
    ]
    out_spec = pl.BlockSpec((tm, D), lambda i: (i, 0))

    out = pl.pallas_call(
        _dense_fusion_kernel,
        out_shape=jax.ShapeDtypeStruct((M, D), jnp.float32),
        grid_spec=pltpu.PrefetchScalarGridSpec(
            num_scalar_prefetch=0,
            grid=(grid,),
            in_specs=in_specs,
            out_specs=out_spec,
        ),
        compiler_params=pltpu.CompilerParams(
            dimension_semantics=("parallel",),
            vmem_limit_bytes=vmem_limit,
        ),
    )(g2, bf, wg_f, wb_f, bias_f, gamma, beta)

    return out.reshape(B, S, D)


def reference_forward(gpt2_features, bert_features, attention_mask, params):
    """Pure-JAX mirror of the (unfused) PyTorch forward, eval mode."""
    del attention_mask
    gp = gpt2_features @ params["wg"] + params["bg"]
    bp = bert_features @ params["wb"] + params["bb"]
    combined = gp + bp
    fused = jnp.tanh(combined @ params["wd"] + params["bd"])
    mu = jnp.mean(fused, axis=-1, keepdims=True)
    var = jnp.mean((fused - mu) ** 2, axis=-1, keepdims=True)
    return (fused - mu) / jnp.sqrt(var + 1e-5) * params["gamma"] + params["beta"]


def make_params(key, gpt2_dim, bert_dim, output_dim):
    ks = jax.random.split(key, 6)
    scale = 0.1
    return {
        # Linear weights stored pre-transposed: (in_features, out_features)
        "wg": scale * jax.random.normal(ks[0], (gpt2_dim, output_dim), jnp.float32),
        "bg": scale * jax.random.normal(ks[1], (1, output_dim), jnp.float32),
        "wb": scale * jax.random.normal(ks[2], (bert_dim, output_dim), jnp.float32),
        "bb": scale * jax.random.normal(ks[3], (1, output_dim), jnp.float32),
        "wd": scale * jax.random.normal(ks[4], (output_dim, output_dim), jnp.float32),
        "bd": scale * jax.random.normal(ks[5], (1, output_dim), jnp.float32),
        # LayerNorm affine params
        "gamma": jnp.ones((1, output_dim), jnp.float32),
        "beta": jnp.zeros((1, output_dim), jnp.float32),
    }


if __name__ == "__main__":
    B, S = 2, 8
    gpt2_dim, bert_dim, output_dim = 32, 48, 32

    key = jax.random.PRNGKey(0)
    k1, k2, kp = jax.random.split(key, 3)
    gpt2_features = jax.random.normal(k1, (B, S, gpt2_dim), jnp.float32)
    bert_features = jax.random.normal(k2, (B, S, bert_dim), jnp.float32)
    attention_mask = jnp.ones((B, S), jnp.int32)  # unused by the module's forward

    params = make_params(kp, gpt2_dim, bert_dim, output_dim)
    ref = reference_forward(gpt2_features, bert_features, attention_mask, params)

    # Default path: bf16 MXU operands, f32 accumulation/epilogue.
    out = dense_fusion(gpt2_features, bert_features, attention_mask, params)
    out = jax.block_until_ready(out)
    assert out.shape == (B, S, output_dim)
    assert jnp.allclose(out, ref, atol=5e-2, rtol=5e-2), "bf16 path mismatch vs reference"

    # Full-f32 MXU path, tight tolerance (checks the algebraic fold exactly).
    out_f32 = jax.block_until_ready(
        dense_fusion(gpt2_features, bert_features, attention_mask, params,
                     compute_dtype=jnp.float32))
    assert jnp.allclose(out_f32, ref, atol=5e-3, rtol=5e-3), "f32 path mismatch vs reference"

    print("KERNEL_OK")
</pallas_src>

<mosaic_0001>
module attributes {stable_mosaic.version = 11 : i64} {
  func.func @_dense_fusion_kernel(%arg0: i32, %arg1: memref<16x32xf32, #tpu.memory_space<vmem>>, %arg2: memref<16x48xf32, #tpu.memory_space<vmem>>, %arg3: memref<32x32xbf16, #tpu.memory_space<vmem>>, %arg4: memref<48x32xbf16, #tpu.memory_space<vmem>>, %arg5: memref<1x32xf32, #tpu.memory_space<vmem>>, %arg6: memref<1x32xf32, #tpu.memory_space<vmem>>, %arg7: memref<1x32xf32, #tpu.memory_space<vmem>>, %arg8: memref<16x32xf32, #tpu.memory_space<vmem>>) attributes {dimension_semantics = [#tpu.dimension_semantics<parallel>], iteration_bounds = array<i64: 1>, scalar_prefetch = 0 : i64, scratch_operands = 0 : i64, tpu.core_type = #tpu.core_type<tc>, window_params = [{transform_indices = @transform_0, window_bounds = array<i64: 16, 32>}, {transform_indices = @transform_1, window_bounds = array<i64: 16, 48>}, {pipeline_mode = #tpu.pipeline_mode<synchronous>, transform_indices = @transform_2, window_bounds = array<i64: 32, 32>}, {pipeline_mode = #tpu.pipeline_mode<synchronous>, transform_indices = @transform_3, window_bounds = array<i64: 48, 32>}, {pipeline_mode = #tpu.pipeline_mode<synchronous>, transform_indices = @transform_4, window_bounds = array<i64: 1, 32>}, {pipeline_mode = #tpu.pipeline_mode<synchronous>, transform_indices = @transform_5, window_bounds = array<i64: 1, 32>}, {pipeline_mode = #tpu.pipeline_mode<synchronous>, transform_indices = @transform_6, window_bounds = array<i64: 1, 32>}, {transform_indices = @transform_7, window_bounds = array<i64: 16, 32>}]} {
    %c0 = arith.constant 0 : index
    %c0_0 = arith.constant 0 : index
    %0 = vector.load %arg1[%c0, %c0_0] : memref<16x32xf32, #tpu.memory_space<vmem>>, vector<16x32xf32>
    %1 = arith.truncf %0 : vector<16x32xf32> to vector<16x32xbf16>
    %c0_1 = arith.constant 0 : index
    %c0_2 = arith.constant 0 : index
    %2 = vector.load %arg3[%c0_1, %c0_2] : memref<32x32xbf16, #tpu.memory_space<vmem>>, vector<32x32xbf16>
    %cst = arith.constant dense<0.000000e+00> : vector<16x32xf32>
    %3 = tpu.matmul %1, %2, %cst {dimension_numbers = #tpu.dot_dimension_numbers<[1], [0], [0], [1], [0, 0, 1, 1], [], []>} : vector<16x32xbf16>, vector<32x32xbf16>, vector<16x32xf32> -> vector<16x32xf32>
    %c0_3 = arith.constant 0 : index
    %c0_4 = arith.constant 0 : index
    %4 = vector.load %arg2[%c0_3, %c0_4] : memref<16x48xf32, #tpu.memory_space<vmem>>, vector<16x48xf32>
    %5 = arith.truncf %4 : vector<16x48xf32> to vector<16x48xbf16>
    %c0_5 = arith.constant 0 : index
    %c0_6 = arith.constant 0 : index
    %6 = vector.load %arg4[%c0_5, %c0_6] : memref<48x32xbf16, #tpu.memory_space<vmem>>, vector<48x32xbf16>
    %cst_7 = arith.constant dense<0.000000e+00> : vector<16x32xf32>
    %7 = tpu.matmul %5, %6, %cst_7 {dimension_numbers = #tpu.dot_dimension_numbers<[1], [0], [0], [1], [0, 0, 1, 1], [], []>} : vector<16x48xbf16>, vector<48x32xbf16>, vector<16x32xf32> -> vector<16x32xf32>
    %8 = arith.addf %3, %7 : vector<16x32xf32>
    %c0_8 = arith.constant 0 : index
    %c0_9 = arith.constant 0 : index
    %9 = vector.load %arg5[%c0_8, %c0_9] : memref<1x32xf32, #tpu.memory_space<vmem>>, vector<1x32xf32>
    %10 = vector.broadcast %9 : vector<1x32xf32> to vector<16x32xf32>
    %11 = arith.addf %8, %10 : vector<16x32xf32>
    %12 = math.tanh %11 : vector<16x32xf32>
    %cst_10 = arith.constant dense<0.000000e+00> : vector<16xf32>
    %13 = vector.multi_reduction <add>, %12, %cst_10 [1] : vector<16x32xf32> to vector<16xf32>
    %14 = vector.shape_cast %13 : vector<16xf32> to vector<16x1xf32>
    %cst_11 = arith.constant 3.200000e+01 : f32
    %15 = vector.broadcast %cst_11 : f32 to vector<16x1xf32>
    %16 = arith.divf %14, %15 : vector<16x1xf32>
    %17 = arith.mulf %12, %12 : vector<16x32xf32>
    %cst_12 = arith.constant dense<0.000000e+00> : vector<16xf32>
    %18 = vector.multi_reduction <add>, %17, %cst_12 [1] : vector<16x32xf32> to vector<16xf32>
    %19 = vector.shape_cast %18 : vector<16xf32> to vector<16x1xf32>
    %cst_13 = arith.constant 3.200000e+01 : f32
    %20 = vector.broadcast %cst_13 : f32 to vector<16x1xf32>
    %21 = arith.divf %19, %20 : vector<16x1xf32>
    %22 = arith.mulf %16, %16 : vector<16x1xf32>
    %23 = arith.subf %21, %22 : vector<16x1xf32>
    %24 = vector.broadcast %16 : vector<16x1xf32> to vector<16x32xf32>
    %25 = arith.subf %12, %24 : vector<16x32xf32>
    %cst_14 = arith.constant 9.99999974E-6 : f32
    %26 = vector.broadcast %cst_14 : f32 to vector<16x1xf32>
    %27 = arith.addf %23, %26 : vector<16x1xf32>
    %28 = math.rsqrt %27 : vector<16x1xf32>
    %29 = vector.broadcast %28 : vector<16x1xf32> to vector<16x32xf32>
    %30 = arith.mulf %25, %29 : vector<16x32xf32>
    %c0_15 = arith.constant 0 : index
    %c0_16 = arith.constant 0 : index
    %31 = vector.load %arg6[%c0_15, %c0_16] : memref<1x32xf32, #tpu.memory_space<vmem>>, vector<1x32xf32>
    %32 = vector.broadcast %31 : vector<1x32xf32> to vector<16x32xf32>
    %33 = arith.mulf %30, %32 : vector<16x32xf32>
    %c0_17 = arith.constant 0 : index
    %c0_18 = arith.constant 0 : index
    %34 = vector.load %arg7[%c0_17, %c0_18] : memref<1x32xf32, #tpu.memory_space<vmem>>, vector<1x32xf32>
    %35 = vector.broadcast %34 : vector<1x32xf32> to vector<16x32xf32>
    %36 = arith.addf %33, %35 : vector<16x32xf32>
    %c0_19 = arith.constant 0 : index
    %c0_20 = arith.constant 0 : index
    %37 = vector.load %arg8[%c0_19, %c0_20] : memref<16x32xf32, #tpu.memory_space<vmem>>, vector<16x32xf32>
    tpu.vector_store %arg8[%c0_19, %c0_20], %36 {strides = array<i32>} : memref<16x32xf32, #tpu.memory_space<vmem>>, vector<16x32xf32>,
    return
  }
  func.func @transform_0(%arg0: i32) -> (i32, i32) {
    %c0_i32 = arith.constant 0 : i32
    %c0_i32_0 = arith.constant 0 : i32
    return %arg0, %c0_i32 : i32, i32
  }
  func.func @transform_1(%arg0: i32) -> (i32, i32) {
    %c0_i32 = arith.constant 0 : i32
    %c0_i32_0 = arith.constant 0 : i32
    return %arg0, %c0_i32 : i32, i32
  }
  func.func @transform_2(%arg0: i32) -> (i32, i32) {
    %c0_i32 = arith.constant 0 : i32
    %c0_i32_0 = arith.constant 0 : i32
    %c0_i32_1 = arith.constant 0 : i32
    return %c0_i32, %c0_i32_0 : i32, i32
  }
  func.func @transform_3(%arg0: i32) -> (i32, i32) {
    %c0_i32 = arith.constant 0 : i32
    %c0_i32_0 = arith.constant 0 : i32
    %c0_i32_1 = arith.constant 0 : i32
    return %c0_i32, %c0_i32_0 : i32, i32
  }
  func.func @transform_4(%arg0: i32) -> (i32, i32) {
    %c0_i32 = arith.constant 0 : i32
    %c0_i32_0 = arith.constant 0 : i32
    %c0_i32_1 = arith.constant 0 : i32
    return %c0_i32, %c0_i32_0 : i32, i32
  }
  func.func @transform_5(%arg0: i32) -> (i32, i32) {
    %c0_i32 = arith.constant 0 : i32
    %c0_i32_0 = arith.constant 0 : i32
    %c0_i32_1 = arith.constant 0 : i32
    return %c0_i32, %c0_i32_0 : i32, i32
  }
  func.func @transform_6(%arg0: i32) -> (i32, i32) {
    %c0_i32 = arith.constant 0 : i32
    %c0_i32_0 = arith.constant 0 : i32
    %c0_i32_1 = arith.constant 0 : i32
    return %c0_i32, %c0_i32_0 : i32, i32
  }
  func.func @transform_7(%arg0: i32) -> (i32, i32) {
    %c0_i32 = arith.constant 0 : i32
    %c0_i32_0 = arith.constant 0 : i32
    return %arg0, %c0_i32 : i32, i32
  }
}

</mosaic_0001>

<bundles_post_ra>
// kernel: tpu_custom_call.1
= control target key start
LH: loop header
LB: loop body
LE: loop exit
PB: predicated region body
PF: predicated region fallthrough
CT: control target
= control target key end

     0   :  { %12 = vsyncpa [#allocation3], 0  ;;  %s470_s0 = inlined_call_operand.vmem [shape: f32[16,32], index: 0, kind: input, shape index: {}]   ;;  %s471_s1 = inlined_call_operand.vmem [shape: f32[16,48], index: 1, kind: input, shape index: {}]   ;;  %s472_s2 = inlined_call_operand.hbm [shape: bf16[32,32], index: 2, kind: input, shape index: {}]   ;;  %s473_s3 = inlined_call_operand.vmem [shape: bf16[48,32], index: 3, kind: input, shape index: {}]   ;;  %s474_s4 = inlined_call_operand.vmem [shape: f32[1,32], index: 4, kind: input, shape index: {}]   ;;  %s475_s5 = inlined_call_operand.vmem [shape: f32[1,32], index: 5, kind: input, shape index: {}]   ;;  %s476_s6 = inlined_call_operand.vmem [shape: f32[1,32], index: 6, kind: input, shape index: {}]   ;;  %s477_s7 = inlined_call_operand.hbm [shape: f32[16,32], index: 7, kind: output, shape index: {}]  }
   0x1   :  { %13 = vsyncpa [#allocation4], 0  ;;  %s361_s24 = smov [#allocation2]   ;;  %s313_s28 = scalar_lea.hbm %s472_s2, 256 }
   0x2   :  { %s23_s25 = sshll.u32 %s361_s24, 4  ;;  %p314_p0 = scmp.ne.s32.totalorder %s472_s2, %s313_s28  ;;  %s24_s25 = int_to_ptr.vmem [resolvable:$true] %s23_s25 }
   0x3   :  { %p317_p1 = scmp.lt.u32.totalorder %s313_s28, %s472_s2 }
   0x5   :  { %p319_p2 = pnand %p317_p1, %p314_p0 }
   0x7   :  { %322 = shalt.err (!%p319_p2)
}
   0x8   :  { %s323_s10 = scalar_lea.vmem %s24_s25, 256  ;;  %p328_p4 = scmp.lt.s32.totalorder %s24_s25, %s24_s25 }
   0x9   :  { %p324_p3 = scmp.ne.s32.totalorder %s24_s25, %s323_s10  ;;  %p329_p5 = scmp.lt.s32.totalorder %s323_s10, %s323_s10 }
   0xb   :  { %p330_p6 = por %p329_p5, %p328_p4 }
   0xd   :  { %p331_p7 = pnand %p330_p6, %p324_p3 }
   0xf   :  { %334 = shalt.err (!%p331_p7)
}
  0x10   :  { %s362_s11 = smov 64   ;;  %s363_s12 = smov 4  }
  0x11   :  { %29 = dma.hbm_to_vmem [thread:$0]  %s472_s2, 256, %s24_s25, [#allocation3], %s362_s11, %s362_s11, %s363_s12  }
  0x12   :  { %357 = dma.done.wait [#allocation3], 256  }
  0x13   :  { %358 = vsyncadd [#allocation3], 4294967040  ;;  %v364_v0 = vmov 0.0   ;;  %vm365_vm0 = vmmov 0   ;;  %v300_v1 = vld [vmem:[%s473_s3] sm:$0xff]   ;;  %v302_v3 = vld [vmem:[%s473_s3 + $0x8] sm:$0xff]  }
  0x14   :  { %274 = vmatprep.subr.bf16.mxu0 %v364_v0  ;;  %284 = vmatprep.subr.bf16.mxu1 %v364_v0  ;;  %v301_v2 = vld [vmem:[#allocation2] sm:$0xff]   ;;  %v303_v4 = vld [vmem:[#allocation2 + $0x8] sm:$0xff]   ;;  %v304_v7 = vld [vmem:[%s473_s3 + $0x10] sm:$0xff]   ;;  %vm133_vm1 = vcmask 261120   ;;  %vm76_vm2 = vcmask 392192   ;;  %s366_s30 = smov [#allocation5]  }
  0x15   :  { %288 = vmatprep.mubr.msk.bf16.mxu1 %vm365_vm0, %v364_v0  ;;  %280 = vmatprep.mubr.msk.bf16.mxu0 %vm365_vm0, %v364_v0  ;;  %v42_v5 = vld [vmem:[%s470_s0] sm:$0xff]  ;;  %v43_v6 = vld [vmem:[%s470_s0 + $0x8] sm:$0xff]  ;;  %s245_s8 = sshll.u32 %s366_s30, 4  ;;  %s246_s8 = int_to_ptr.vmem [resolvable:$true] %s245_s8 }
  0x16   :  { %275 = vmatpush3.bf16.msra.mxu0 %v300_v1  ;;  %285 = vmatpush3.bf16.msra.mxu1 %v301_v2  ;;  %v44_v8 = vpack.c.bf16 %v43_v6, %v42_v5  ;;  %v49_v9 = vld [vmem:[%s471_s1] sm:$0xff]  ;;  %v50_v10 = vld [vmem:[%s471_s1 + $0x8] sm:$0xff]  ;;  %p340_p9 = scmp.lt.s32.totalorder %s246_s8, %s246_s8 }
  0x17   :  { %276 = vmatprep.subr.bf16.mxu0 %v364_v0  ;;  %286 = vmatprep.subr.bf16.mxu1 %v364_v0  ;;  %v51_v11 = vpack.c.bf16 %v50_v10, %v49_v9  ;;  %v264_v16 = vld [vmem:[%s474_s4] ss:$0 sm:$0xff] }
  0x18   :  { %v265_v49 = vld [vmem:[%s475_s5] ss:$0 sm:$0xff]  ;;  %s335_s5 = scalar_lea.vmem %s246_s8, 256 }
  0x19   :  { %v266_v51 = vld [vmem:[%s476_s6] ss:$0 sm:$0xff]  ;;  %p336_p8 = scmp.ne.s32.totalorder %s246_s8, %s335_s5  ;;  %p341_p10 = scmp.lt.s32.totalorder %s335_s5, %s335_s5 }
  0x1a   :  { %277 = vmatpush3.bf16.msra.mxu0 %v302_v3  ;;  %287 = vmatpush3.bf16.msra.mxu1 %v303_v4 }
  0x1b   :  { %278 = vmatprep.subr.bf16.mxu0 %v364_v0  ;;  %p342_p11 = por %p341_p10, %p340_p9 }
  0x1d   :  { %289 = vmatmul.mubr.msk.bf16.vlgmr.msra.gmra.mrb[0].mxu1 %vm133_vm1, %v44_v8  ;;  %p343_p12 = pnand %p342_p11, %p336_p8 }
  0x1e   :  { %279 = vmatpush3.bf16.msra.mxu0 %v304_v7 }
  0x21   :  { %281 = vmatmul.mubr.msk.bf16.vlgmr.msra.gmra.mrb[0].mxu0 %vm76_vm2, %v51_v11 }
  0xf0   :  { %v171_v12 = vpop.f32.mrb[0].mxu1 }
  0xf1   :  { %v290_v13 = vpop.f32.mrb[1].mxu1 }
  0xf2   :  { %v174_v14 = vpop.f32.mrb[2].mxu1 }
  0xf3   :  { %v291_v17 = vpop.f32.mrb[3].mxu1 }
  0xf4   :  { %v114_v15 = vpop.f32.mrb[0].mxu0 }
  0xf5   :  { %v172_v18 = vadd.f32 %v171_v12, %v114_v15  ;;  %v282_v19 = vpop.f32.mrb[1].mxu0 }
  0xf6   :  { %v117_v20 = vpop.f32.mrb[2].mxu0 }
  0xf7   :  { %v185_v21 = vadd.f32 %v264_v16, %v172_v18  ;;  %v175_v22 = vadd.f32 %v174_v14, %v117_v20  ;;  %v283_v23 = vpop.f32.mrb[3].mxu0 }
  0xf9   :  { %305 = vtanh.f32 %v185_v21  ;;  %v186_v24 = vadd.f32 %v264_v16, %v175_v22 }
  0xfb   :  { %307 = vtanh.f32 %v186_v24 }
 0x103   :  { %v306_v25 = vpop.eup %305 }
 0x104   :  { %v189_v26 = vsel %vm133_vm1, %v306_v25, 0.0  ;;  %v198_v27 = vmul.f32 %v306_v25, %v306_v25 }
 0x105   :  { %v308_v28 = vpop.eup %307  ;;  %190 = vadd.xlane.f32.xlu0 %v189_v26 }
 0x106   :  { %v200_v29 = vsel %vm133_vm1, %v198_v27, 0.0  ;;  %v199_v30 = vmul.f32 %v308_v28, %v308_v28  ;;  %v192_v31 = vsel %vm133_vm1, %v308_v28, 0.0 }
 0x107   :  { %201 = vadd.xlane.f32.xlu1 %v200_v29 }
 0x108   :  { %v203_v32 = vsel %vm133_vm1, %v199_v30, 0.0 }
 0x109   :  { %193 = vadd.xlane.f32.xlu0 %v192_v31 }
 0x10b   :  { %204 = vadd.xlane.f32.xlu1 %v203_v32 }
 0x192   :  { %v191_v33 = vpop.xlane.xlu0 %190 }
 0x193   :  { %v196_v34 = vmul.f32 0.03125, %v191_v33 }
 0x194   :  { %v202_v35 = vpop.xlane.xlu1 %201 }
 0x195   :  { %v208_v36 = vmul.f32 %v196_v34, %v196_v34  ;;  %v206_v37 = vmul.f32 0.03125, %v202_v35  ;;  %v212_v47 = vsub.f32 %v306_v25, %v196_v34 }
 0x196   :  { %v194_v38 = vpop.xlane.xlu0 %193 }
 0x197   :  { %v210_v39 = vsub.f32 %v206_v37, %v208_v36  ;;  %v197_v40 = vmul.f32 0.03125, %v194_v38 }
 0x198   :  { %v205_v41 = vpop.xlane.xlu1 %204 }
 0x199   :  { %v214_v42 = vadd.f32 1e-05, %v210_v39  ;;  %v209_v43 = vmul.f32 %v197_v40, %v197_v40  ;;  %v207_v44 = vmul.f32 0.03125, %v205_v41  ;;  %v213_v52 = vsub.f32 %v308_v28, %v197_v40 }
 0x19b   :  { %309 = vrsqrt.f32 %v214_v42  ;;  %v211_v45 = vsub.f32 %v207_v44, %v209_v43 }
 0x19d   :  { %v215_v46 = vadd.f32 1e-05, %v211_v45 }
 0x19f   :  { %311 = vrsqrt.f32 %v215_v46 }
 0x1a5   :  { %v310_v48 = vpop.eup %309 }
 0x1a6   :  { %v218_v50 = vmul.f32 %v310_v48, %v212_v47 }
 0x1a8   :  { %v227_v53 = vmul.f32 %v265_v49, %v218_v50 }
 0x1a9   :  { %v312_v54 = vpop.eup %311 }
 0x1aa   :  { %v219_v55 = vmul.f32 %v312_v54, %v213_v52  ;;  %v236_v56 = vadd.f32 %v266_v51, %v227_v53 }
 0x1ac   :  { %v228_v57 = vmul.f32 %v265_v49, %v219_v55  ;;  %238 = vst.msk [vmem:[#allocation5] sm:$0xff] %vm133_vm1, %v236_v56 }
 0x1ae   :  { %v237_v58 = vadd.f32 %v266_v51, %v228_v57 }
 0x1b0   :  { %239 = vst.msk [vmem:[#allocation5 + $0x8] sm:$0xff] %vm133_vm1, %v237_v58 }
 0x1b1   :  { %346 = shalt.err (!%p343_p12)
}
 0x1b2   :  { %s347_s10 = scalar_lea.hbm %s477_s7, 256 }
 0x1b3   :  { %p348_p13 = scmp.ne.s32.totalorder %s477_s7, %s347_s10  ;;  %p351_p0 = scmp.lt.u32.totalorder %s347_s10, %s477_s7 }
 0x1b5   :  { %p353_p1 = pnand %p351_p0, %p348_p13 }
 0x1b7   :  { %356 = shalt.err (!%p353_p1)
}
 0x1b8   :  { %s367_s15 = smov 128   ;;  %s368_s16 = smov 8  }
 0x1b9   :  { %251 = dma.vmem_to_hbm [thread:$0]  %s246_s8, 256, %s477_s7, [#allocation4], %s367_s15, %s367_s15, %s368_s16  }
 0x1ba   :  { %359 = dma.done.wait [#allocation4], 256  }
 0x1bb   :  { %360 = vsyncadd [#allocation4], 4294967040 }
 0x1bc   :  { %255 = vsyncpa [#allocation3], 1 }
 0x1bd   :  { %256 = vsyncpa [#allocation4], 1 }

</bundles_post_ra>
